<compile_context>
chip_gen: v7x
topology: tpu7x:2x2x1
jax: 0.10.0
libtpu: 0.0.40
codegen_flags: <defaults>
</compile_context>

<pallas_src>
import functools

import jax
import jax.numpy as jnp
from jax.experimental import pallas as pl
from jax.experimental.pallas import tpu as pltpu


def _cdiv(a, b):
    return (a + b - 1) // b


def _round_up(x, m):
    return _cdiv(x, m) * m


# ---------------------------------------------------------------------------
# Per-generation VMEM budgets
# ---------------------------------------------------------------------------
def _vmem_budgets():
    """Returns (vmem_limit_bytes, logits_block_budget_bytes)."""
    phys = 128 << 20
    try:
        info = pltpu.get_tpu_info()
        phys = int(getattr(info, "vmem_capacity_bytes", phys))
    except Exception:
        pass
    if phys <= (96 << 20):            # v7x-class: 64 MiB VMEM per TensorCore
        return 48 << 20, 2 << 20
    return 80 << 20, 4 << 20          # v5e / v6e: 128 MiB physical VMEM


# ---------------------------------------------------------------------------
# pltpu.roll rotate-convention probe (one tiny kernel, cached)
# ---------------------------------------------------------------------------
_ROLL_NP_STYLE = "unset"


def _probe_roll_np_style():
    """True  -> roll(x, s)[i] == x[(i - s) % L]  (np.roll convention)
       False -> roll(x, s)[i] == x[(i + s) % L]
       None  -> pltpu.roll unusable; use the row-wise fallback kernel."""
    global _ROLL_NP_STYLE
    if _ROLL_NP_STYLE != "unset":
        return _ROLL_NP_STYLE

    def kern(x_ref, o_ref):
        o_ref[...] = pltpu.roll(x_ref[...], 1, 1)

    try:
        x = jax.lax.broadcasted_iota(jnp.float32, (8, 128), 1)
        out = pl.pallas_call(
            kern, out_shape=jax.ShapeDtypeStruct((8, 128), jnp.float32))(x)
        first = float(jax.block_until_ready(out)[0, 0])
        if first == 127.0:
            _ROLL_NP_STYLE = True
        elif first == 1.0:
            _ROLL_NP_STYLE = False
        else:
            _ROLL_NP_STYLE = None
    except Exception:
        _ROLL_NP_STYLE = None
    return _ROLL_NP_STYLE


# ---------------------------------------------------------------------------
# Segmented (per C-lane group) helpers used by the packed kernel
# ---------------------------------------------------------------------------
def _take_from(v, delta, np_style):
    """w[..., p] = v[..., (p + delta) % L] for a static integer delta."""
    L = v.shape[-1]
    shift = (-delta) % L if np_style else delta % L
    return pltpu.roll(v, shift, 1)


def _group_max(x, col, C, np_style):
    """Per-lane max over its own C-lane group (bidirectional doubling tree)."""
    m = x
    s = 1
    while s < C:
        hi = _take_from(m, s, np_style)
        lo = _take_from(m, -s, np_style)
        m = jnp.maximum(m, jnp.where(col + s < C, hi, -jnp.inf))
        m = jnp.maximum(m, jnp.where(col >= s, lo, -jnp.inf))
        s *= 2
    return m


def _group_total_at_first_lane(v, col, C, np_style):
    """Segmented suffix sum: lanes with col == 0 end up with the full
    per-group sum of v (other lanes hold partial sums)."""
    s = 1
    while s < C:
        hi = _take_from(v, s, np_style)
        v = v + jnp.where(col + s < C, hi, 0.0)
        s *= 2
    return v


def _focal_weight(base, gamma):
    g = float(gamma)
    if g == 2.0:
        return jnp.square(base)                    # VPU mul, no EUP pow
    if g == int(g) and g >= 0.0:
        return jax.lax.integer_pow(base, int(g))
    return base ** g


# ---------------------------------------------------------------------------
# Packed-lane kernel (C < 128 and 128 % C == 0)
# ---------------------------------------------------------------------------
def _focal_packed_kernel(x_ref, t_ref, out_ref, *, C, k, gamma, n_valid,
                         tile_rows, np_style):
    L = C * k                                                   # == 128
    x = x_ref[...].astype(jnp.float32)                          # (TR, L)
    lane = jax.lax.broadcasted_iota(jnp.int32, x.shape, 1)
    col = lane % C                                              # class-in-sample

    # Numerically stable per-sample log-softmax pieces, on packed lanes.
    m = _group_max(x, col, C, np_style)                         # per-sample max
    z = x - m
    e = jnp.exp(z)

    # Expand per-sample targets (TR, k) to per-lane values with an exact 0/1
    # matmul (operands are exact at any MXU precision), then one-hot select.
    t = t_ref[...].astype(jnp.float32)                          # (TR, k)
    gi = jax.lax.broadcasted_iota(jnp.int32, (k, L), 0)
    lj = jax.lax.broadcasted_iota(jnp.int32, (k, L), 1)
    expand = (lj // C == gi).astype(jnp.float32)                # (k, L)
    t_lane = jnp.dot(t, expand, preferred_element_type=jnp.float32)
    onehot = col.astype(jnp.float32) == t_lane
    zt = jnp.where(onehot, z, 0.0)

    # Segmented totals; each sample's first lane (col == 0) holds the result.
    sum_e = _group_total_at_first_lane(e, col, C, np_style)
    z_tgt = _group_total_at_first_lane(zt, col, C, np_style)

    # One loss value per *valid* sample, placed at its first lane.
    row = jax.lax.broadcasted_iota(jnp.int32, x.shape, 0)
    sample = (pl.program_id(0) * tile_rows + row) * k + lane // C
    live = jnp.logical_and(col == 0, sample < n_valid)

    ce = jnp.where(live, jnp.maximum(jnp.log(sum_e) - z_tgt, 0.0), 0.0)
    pt = jnp.exp(-ce)
    base = jnp.maximum(1.0 - pt, 0.0)
    w = _focal_weight(base, gamma)
    loss = jnp.where(live, w * ce, 0.0)

    # Lane-dense per-block partial sums; final tiny reduction in the wrapper.
    out_ref[...] = jnp.sum(loss, axis=0, keepdims=True)         # (1, L)


def _focal_loss_packed(logits, targets, alpha, gamma, np_style,
                       vmem_limit, block_budget):
    N, C = logits.shape
    k = 128 // C
    L = k * C                                                   # == 128
    itemsize = jnp.dtype(logits.dtype).itemsize
    row_bytes = L * itemsize

    R = _cdiv(N, k)                                             # packed rows
    cap = max(8, (block_budget // row_bytes) // 8 * 8)
    tile_rows = min(cap, _round_up(R, 8))
    if R > 16:                              # keep >= 2 blocks for 2-TC chips
        tile_rows = min(tile_rows, _round_up(_cdiv(R, 2), 8))
    tile_rows = max(8, tile_rows)
    r_pad = _round_up(R, tile_rows)
    grid_n = r_pad // tile_rows
    n_pack = r_pad * k

    if n_pack != N:
        # NOTE: jnp.pad copies; callers controlling batch size can keep N a
        # multiple of (128 // C) * tile_rows for the fully zero-copy path.
        logits = jnp.pad(logits, ((0, n_pack - N), (0, 0)))
        targets = jnp.pad(targets, ((0, n_pack - N),))
    x = logits.reshape(r_pad, L)                                # zero-copy repack
    t = targets.astype(jnp.int32).reshape(r_pad, k)

    kernel = functools.partial(
        _focal_packed_kernel, C=C, k=k, gamma=gamma, n_valid=N,
        tile_rows=tile_rows, np_style=np_style)

    cost = pl.CostEstimate(
        flops=int(N * (6 * C + 24)),
        transcendentals=int(N * (C + 2)),
        bytes_accessed=int(N * C * itemsize + N * 4 + grid_n * L * 4),
    )

    partials = pl.pallas_call(
        kernel,
        out_shape=jax.ShapeDtypeStruct((grid_n, L), jnp.float32),
        grid_spec=pltpu.PrefetchScalarGridSpec(
            num_scalar_prefetch=0,
            grid=(grid_n,),
            in_specs=[
                pl.BlockSpec((tile_rows, L), lambda i: (i, 0)),
                pl.BlockSpec((tile_rows, k), lambda i: (i, 0)),
            ],
            out_specs=pl.BlockSpec((1, L), lambda i: (i, 0)),
        ),
        compiler_params=pltpu.CompilerParams(
            dimension_semantics=("parallel",),
            vmem_limit_bytes=int(vmem_limit),
        ),
        cost_estimate=cost,
    )(x, t)

    return alpha * jnp.sum(partials) / N


# ---------------------------------------------------------------------------
# Row-wise fallback kernel (any C)
# ---------------------------------------------------------------------------
def _focal_rowwise_kernel(x_ref, t_ref, out_ref, *, gamma, n_valid, tile_rows):
    x = x_ref[...].astype(jnp.float32)                          # (TR, C)
    t = t_ref[...]                                              # (TR, 1) int32

    m = jnp.max(x, axis=-1, keepdims=True)
    z = x - m
    lse = jnp.log(jnp.sum(jnp.exp(z), axis=-1, keepdims=True))
    col = jax.lax.broadcasted_iota(jnp.int32, x.shape, 1)
    tgt = jnp.sum(jnp.where(col == t, z, 0.0), axis=-1, keepdims=True)

    ce = jnp.maximum(lse - tgt, 0.0)
    pt = jnp.exp(-ce)
    base = jnp.maximum(1.0 - pt, 0.0)
    w = _focal_weight(base, gamma)

    row = jax.lax.broadcasted_iota(jnp.int32, (x.shape[0], 1), 0)
    live = (pl.program_id(0) * tile_rows + row) < n_valid
    loss = jnp.where(live, w * ce, 0.0)                         # (TR, 1)

    # Per-block partial sum, written as a lane-dense (1, 128) row.
    psum = jnp.sum(loss, axis=0, keepdims=True)                 # (1, 1)
    out_ref[...] = psum + jnp.zeros((1, 128), jnp.float32)


def _focal_loss_rowwise(logits, targets, alpha, gamma, vmem_limit, block_budget):
    N, C = logits.shape
    itemsize = jnp.dtype(logits.dtype).itemsize
    row_bytes = _round_up(C, 128) * itemsize        # VMEM lane padding

    cap = max(8, (block_budget // row_bytes) // 8 * 8)
    tile_rows = min(cap, _round_up(N, 8))
    if N > 16:
        tile_rows = min(tile_rows, _round_up(_cdiv(N, 2), 8))
    tile_rows = max(8, tile_rows)
    n_pad = _round_up(N, tile_rows)
    grid_n = n_pad // tile_rows

    if n_pad != N:
        logits = jnp.pad(logits, ((0, n_pad - N), (0, 0)))
        targets = jnp.pad(targets, ((0, n_pad - N),))
    t2 = targets.astype(jnp.int32).reshape(n_pad, 1)

    kernel = functools.partial(_focal_rowwise_kernel, gamma=gamma,
                               n_valid=N, tile_rows=tile_rows)

    cost = pl.CostEstimate(
        flops=int(N * (6 * C + 24)),
        transcendentals=int(N * (C + 2)),
        bytes_accessed=int(N * C * itemsize + N * 4 + grid_n * 128 * 4),
    )

    partials = pl.pallas_call(
        kernel,
        out_shape=jax.ShapeDtypeStruct((grid_n, 128), jnp.float32),
        grid_spec=pltpu.PrefetchScalarGridSpec(
            num_scalar_prefetch=0,
            grid=(grid_n,),
            in_specs=[
                pl.BlockSpec((tile_rows, C), lambda i: (i, 0)),
                pl.BlockSpec((tile_rows, 1), lambda i: (i, 0)),
            ],
            out_specs=pl.BlockSpec((1, 128), lambda i: (i, 0)),
        ),
        compiler_params=pltpu.CompilerParams(
            dimension_semantics=("parallel",),
            vmem_limit_bytes=int(vmem_limit),
        ),
        cost_estimate=cost,
    )(logits, t2)

    return alpha * jnp.sum(partials[:, 0]) / N


# ---------------------------------------------------------------------------
# Public entry point
# ---------------------------------------------------------------------------
def focal_loss(logits, targets, alpha=0.25, gamma=2.0):
    """Pallas TPU FocalLoss.forward: mean(alpha * (1 - pt)**gamma * ce)."""
    _, C = logits.shape
    vmem_limit, block_budget = _vmem_budgets()
    if 0 < C < 128 and 128 % C == 0:
        np_style = _probe_roll_np_style()
        if np_style is not None:
            try:
                return _focal_loss_packed(logits, targets, alpha, gamma,
                                          np_style, vmem_limit, block_budget)
            except Exception:
                pass  # fall back to the row-wise kernel below
    return _focal_loss_rowwise(logits, targets, alpha, gamma,
                               vmem_limit, block_budget)


def focal_loss_reference(logits, targets, alpha=0.25, gamma=2.0):
    # Pure-JAX reference mirroring the PyTorch module.
    logz = jax.nn.log_softmax(logits.astype(jnp.float32), axis=-1)
    ce = -jnp.take_along_axis(logz, targets[:, None].astype(jnp.int32), axis=-1)[:, 0]
    pt = jnp.exp(-ce)
    return jnp.mean(alpha * (1.0 - pt) ** gamma * ce)


if __name__ == "__main__":
    key = jax.random.PRNGKey(0)

    def run_case(n, c, case_key):
        kl, kt = jax.random.split(case_key)
        logits = jax.random.normal(kl, (n, c), dtype=jnp.float32)
        targets = jax.random.randint(kt, (n,), 0, c, dtype=jnp.int32)
        got = jax.block_until_ready(focal_loss(logits, targets))
        ref = focal_loss_reference(logits, targets)
        assert jnp.allclose(got, ref, rtol=1e-5, atol=1e-6), (n, c, got, ref)

    keys = jax.random.split(key, 4)
    run_case(16, 8, keys[0])      # packed path (C divides 128), single block
    run_case(13, 8, keys[1])      # packed path with ragged padding (masked in-kernel)
    run_case(2048, 8, keys[2])    # packed path, 2 independent ("parallel") blocks
    run_case(37, 12, keys[3])     # row-wise fallback path (C does not divide 128)

    print("KERNEL_OK")
</pallas_src>

<mosaic_0001>
module attributes {stable_mosaic.version = 11 : i64} {
  func.func @kern(%arg0: memref<8x128xf32, #tpu.memory_space<vmem>>, %arg1: memref<8x128xf32, #tpu.memory_space<vmem>>) attributes {dimension_semantics = [], scalar_prefetch = 0 : i64, scratch_operands = 0 : i64, tpu.core_type = #tpu.core_type<tc>} {
    %c0 = arith.constant 0 : index
    %c0_0 = arith.constant 0 : index
    %0 = vector.load %arg0[%c0, %c0_0] : memref<8x128xf32, #tpu.memory_space<vmem>>, vector<8x128xf32>
    %c1_i32 = arith.constant 1 : i32
    %1 = tpu.dynamic_rotate %0 by %c1_i32 dim 1 : vector<8x128xf32>, i32 -> vector<8x128xf32>
    %c0_1 = arith.constant 0 : index
    %c0_2 = arith.constant 0 : index
    %2 = vector.load %arg1[%c0_1, %c0_2] : memref<8x128xf32, #tpu.memory_space<vmem>>, vector<8x128xf32>
    tpu.vector_store %arg1[%c0_1, %c0_2], %1 {strides = array<i32>} : memref<8x128xf32, #tpu.memory_space<vmem>>, vector<8x128xf32>,
    return
  }
}

module attributes {stable_mosaic.version = 11 : i64} {
  func.func @_focal_rowwise_kernel(%arg0: i32, %arg1: memref<16x8xf32, #tpu.memory_space<vmem>>, %arg2: memref<16x1xi32, #tpu.memory_space<vmem>>, %arg3: memref<1x128xf32, #tpu.memory_space<vmem>>) attributes {dimension_semantics = [#tpu.dimension_semantics<parallel>], iteration_bounds = array<i64: 1>, scalar_prefetch = 0 : i64, scratch_operands = 0 : i64, tpu.core_type = #tpu.core_type<tc>, window_params = [{transform_indices = @transform_0, window_bounds = array<i64: 16, 8>}, {transform_indices = @transform_1, window_bounds = array<i64: 16, 1>}, {transform_indices = @transform_2, window_bounds = array<i64: 1, 128>}]} {
    %c0 = arith.constant 0 : index
    %c0_0 = arith.constant 0 : index
    %0 = vector.load %arg1[%c0, %c0_0] : memref<16x8xf32, #tpu.memory_space<vmem>>, vector<16x8xf32>
    %c0_1 = arith.constant 0 : index
    %c0_2 = arith.constant 0 : index
    %1 = vector.load %arg2[%c0_1, %c0_2] : memref<16x1xi32, #tpu.memory_space<vmem>>, vector<16x1xi32>
    %cst = arith.constant dense<0xFF800000> : vector<16xf32>
    %2 = vector.multi_reduction <maximumf>, %0, %cst [1] : vector<16x8xf32> to vector<16xf32>
    %3 = vector.shape_cast %2 : vector<16xf32> to vector<16x1xf32>
    %4 = vector.broadcast %3 : vector<16x1xf32> to vector<16x8xf32>
    %5 = arith.subf %0, %4 : vector<16x8xf32>
    %6 = math.exp %5 : vector<16x8xf32>
    %cst_3 = arith.constant dense<0.000000e+00> : vector<16xf32>
    %7 = vector.multi_reduction <add>, %6, %cst_3 [1] : vector<16x8xf32> to vector<16xf32>
    %8 = vector.shape_cast %7 : vector<16xf32> to vector<16x1xf32>
    %9 = math.log %8 : vector<16x1xf32>
    %10 = tpu.iota {dimensions = array<i32: 1>} : vector<16x8xi32>
    %11 = vector.broadcast %1 : vector<16x1xi32> to vector<16x8xi32>
    %12 = arith.cmpi eq, %10, %11 : vector<16x8xi32>
    %cst_4 = arith.constant 0.000000e+00 : f32
    %13 = vector.broadcast %cst_4 : f32 to vector<16x8xf32>
    %14 = arith.select %12, %5, %13 : vector<16x8xi1>, vector<16x8xf32>
    %cst_5 = arith.constant dense<0.000000e+00> : vector<16xf32>
    %15 = vector.multi_reduction <add>, %14, %cst_5 [1] : vector<16x8xf32> to vector<16xf32>
    %16 = vector.shape_cast %15 : vector<16xf32> to vector<16x1xf32>
    %17 = arith.subf %9, %16 : vector<16x1xf32>
    %cst_6 = arith.constant 0.000000e+00 : f32
    %18 = vector.broadcast %cst_6 : f32 to vector<16x1xf32>
    %19 = arith.maximumf %17, %18 : vector<16x1xf32>
    %cst_7 = arith.constant 0.000000e+00 : f32
    %20 = vector.broadcast %cst_7 : f32 to vector<16x1xf32>
    %21 = arith.subf %20, %19 : vector<16x1xf32>
    %22 = math.exp %21 : vector<16x1xf32>
    %cst_8 = arith.constant 1.000000e+00 : f32
    %23 = vector.broadcast %cst_8 : f32 to vector<16x1xf32>
    %24 = arith.subf %23, %22 : vector<16x1xf32>
    %cst_9 = arith.constant 0.000000e+00 : f32
    %25 = vector.broadcast %cst_9 : f32 to vector<16x1xf32>
    %26 = arith.maximumf %24, %25 : vector<16x1xf32>
    %27 = arith.mulf %26, %26 : vector<16x1xf32>
    %28 = tpu.iota {dimensions = array<i32: 0>} : vector<16x1xi32>
    %c16_i32 = arith.constant 16 : i32
    %29 = arith.muli %arg0, %c16_i32 : i32
    %30 = vector.broadcast %29 : i32 to vector<16x1xi32>
    %31 = arith.addi %30, %28 : vector<16x1xi32>
    %c16_i32_10 = arith.constant 16 : i32
    %32 = vector.broadcast %c16_i32_10 : i32 to vector<16x1xi32>
    %33 = arith.cmpi slt, %31, %32 : vector<16x1xi32>
    %34 = arith.mulf %27, %19 : vector<16x1xf32>
    %cst_11 = arith.constant 0.000000e+00 : f32
    %35 = vector.broadcast %cst_11 : f32 to vector<16x1xf32>
    %36 = arith.select %33, %34, %35 : vector<16x1xi1>, vector<16x1xf32>
    %cst_12 = arith.constant dense<0.000000e+00> : vector<1xf32>
    %37 = vector.multi_reduction <add>, %36, %cst_12 [0] : vector<16x1xf32> to vector<1xf32>
    %38 = vector.shape_cast %37 : vector<1xf32> to vector<1x1xf32>
    %cst_13 = arith.constant 0.000000e+00 : f32
    %39 = vector.broadcast %cst_13 : f32 to vector<1x128xf32>
    %40 = vector.broadcast %38 : vector<1x1xf32> to vector<1x128xf32>
    %41 = arith.addf %40, %39 : vector<1x128xf32>
    %c0_14 = arith.constant 0 : index
    %c0_15 = arith.constant 0 : index
    %42 = vector.load %arg3[%c0_14, %c0_15] : memref<1x128xf32, #tpu.memory_space<vmem>>, vector<1x128xf32>
    tpu.vector_store %arg3[%c0_14, %c0_15], %41 {strides = array<i32>} : memref<1x128xf32, #tpu.memory_space<vmem>>, vector<1x128xf32>,
    return
  }
  func.func @transform_0(%arg0: i32) -> (i32, i32) {
    %c0_i32 = arith.constant 0 : i32
    %c0_i32_0 = arith.constant 0 : i32
    return %arg0, %c0_i32 : i32, i32
  }
  func.func @transform_1(%arg0: i32) -> (i32, i32) {
    %c0_i32 = arith.constant 0 : i32
    %c0_i32_0 = arith.constant 0 : i32
    return %arg0, %c0_i32 : i32, i32
  }
  func.func @transform_2(%arg0: i32) -> (i32, i32) {
    %c0_i32 = arith.constant 0 : i32
    %c0_i32_0 = arith.constant 0 : i32
    return %arg0, %c0_i32 : i32, i32
  }
}

</mosaic_0001>

<bundles_post_ra>
// kernel: tpu_custom_call.1
= control target key start
LH: loop header
LB: loop body
LE: loop exit
PB: predicated region body
PF: predicated region fallthrough
CT: control target
= control target key end

     0   :  { %6 = vsyncpa [#allocation3], 0  ;;  %s128_s0 = inlined_call_operand.hbm [shape: f32[8,128], index: 0, kind: input, shape index: {}]   ;;  %s129_s1 = inlined_call_operand.hbm [shape: f32[8,128], index: 1, kind: output, shape index: {}]  }
   0x1   :  { %7 = vsyncpa [#allocation4], 0  ;;  %s91_s6 = smov [#allocation2]   ;;  %s43_s10 = scalar_lea.hbm %s128_s0, 128 }
   0x2   :  { %s14_s7 = sshll.u32 %s91_s6, 4  ;;  %p44_p0 = scmp.ne.s32.totalorder %s128_s0, %s43_s10  ;;  %s15_s7 = int_to_ptr.vmem [resolvable:$true] %s14_s7 }
   0x3   :  { %p47_p1 = scmp.lt.u32.totalorder %s43_s10, %s128_s0 }
   0x5   :  { %p49_p2 = pnand %p47_p1, %p44_p0 }
   0x7   :  { %52 = shalt.err (!%p49_p2)
}
   0x8   :  { %s53_s15 = scalar_lea.vmem %s15_s7, 128  ;;  %p58_p4 = scmp.lt.s32.totalorder %s15_s7, %s15_s7 }
   0x9   :  { %p54_p3 = scmp.ne.s32.totalorder %s15_s7, %s53_s15  ;;  %p59_p5 = scmp.lt.s32.totalorder %s53_s15, %s53_s15 }
   0xb   :  { %p60_p6 = por %p59_p5, %p58_p4 }
   0xd   :  { %p61_p7 = pnand %p60_p6, %p54_p3 }
   0xf   :  { %64 = shalt.err (!%p61_p7)
}
  0x10   :  { %17 = dma.hbm_to_vmem [thread:$0]  %s128_s0, 128, %s15_s7, [#allocation3]  }
  0x11   :  { %87 = dma.done.wait [#allocation3], 128  }
  0x12   :  { %88 = vsyncadd [#allocation3], 4294967168  ;;  %v21_v0 = vld [vmem:[#allocation2] sm:$0xff]  ;;  %s92_s18 = smov 1   ;;  %s93_s19 = smov [#allocation5]  }
  0x13   :  { %22 = vrot.lane.b32.xlu0 %v21_v0, %s92_s18  ;;  %s31_s20 = sshll.u32 %s93_s19, 4  ;;  %s32_s20 = int_to_ptr.vmem [resolvable:$true] %s31_s20 }
  0x14   :  { %s65_s21 = scalar_lea.vmem %s32_s20, 128  ;;  %p70_p9 = scmp.lt.s32.totalorder %s32_s20, %s32_s20 }
  0x15   :  { %p66_p8 = scmp.ne.s32.totalorder %s32_s20, %s65_s21  ;;  %p71_p10 = scmp.lt.s32.totalorder %s65_s21, %s65_s21 }
  0x17   :  { %p72_p11 = por %p71_p10, %p70_p9 }
  0x19   :  { %p73_p12 = pnand %p72_p11, %p66_p8 }
  0x85   :  { %v23_v1 = vpop.permute.xlu0 %22 }
  0x86   :  { %24 = vst [vmem:[#allocation5] sm:$0xff] %v23_v1 }
  0x87   :  { %76 = shalt.err (!%p73_p12)
}
  0x88   :  { %s77_s0 = scalar_lea.hbm %s129_s1, 128 }
  0x89   :  { %p78_p13 = scmp.ne.s32.totalorder %s129_s1, %s77_s0  ;;  %p81_p0 = scmp.lt.u32.totalorder %s77_s0, %s129_s1 }
  0x8b   :  { %p83_p1 = pnand %p81_p0, %p78_p13 }
  0x8d   :  { %86 = shalt.err (!%p83_p1)
}
  0x8e   :  { %34 = dma.vmem_to_hbm [thread:$0]  %s32_s20, 128, %s129_s1, [#allocation4]  }
  0x8f   :  { %89 = dma.done.wait [#allocation4], 128  }
  0x90   :  { %90 = vsyncadd [#allocation4], 4294967168 }
  0x91   :  { %38 = vsyncpa [#allocation3], 1 }
  0x92   :  { %39 = vsyncpa [#allocation4], 1 }

// kernel: tpu_custom_call.1
= control target key start
LH: loop header
LB: loop body
LE: loop exit
PB: predicated region body
PF: predicated region fallthrough
CT: control target
= control target key end

     0   :  { %7 = vsyncpa [#allocation3], 0  ;;  %s294_s0 = inlined_call_operand.hbm [shape: f32[16,8], index: 0, kind: input, shape index: {}]   ;;  %s295_s1 = inlined_call_operand.hbm [shape: s32[16,1], index: 1, kind: input, shape index: {}]   ;;  %s296_s2 = inlined_call_operand.hbm [shape: f32[1,128], index: 2, kind: output, shape index: {}]  }
   0x1   :  { %8 = vsyncpa [#allocation6], 0 }
   0x2   :  { %9 = vsyncpa [#allocation4], 0  ;;  %s231_s9 = smov [#allocation2]   ;;  %s159_s13 = scalar_lea.hbm %s294_s0, 256 }
   0x3   :  { %s15_s10 = sshll.u32 %s231_s9, 4  ;;  %p160_p0 = scmp.ne.s32.totalorder %s294_s0, %s159_s13  ;;  %s16_s10 = int_to_ptr.vmem [resolvable:$true] %s15_s10 }
   0x4   :  { %p163_p1 = scmp.lt.u32.totalorder %s159_s13, %s294_s0 }
   0x6   :  { %p165_p2 = pnand %p163_p1, %p160_p0 }
   0x8   :  { %168 = shalt.err (!%p165_p2)
}
   0x9   :  { %s169_s18 = scalar_lea.vmem %s16_s10, 256  ;;  %p174_p4 = scmp.lt.s32.totalorder %s16_s10, %s16_s10 }
   0xa   :  { %p170_p3 = scmp.ne.s32.totalorder %s16_s10, %s169_s18  ;;  %p175_p5 = scmp.lt.s32.totalorder %s169_s18, %s169_s18 }
   0xc   :  { %p176_p6 = por %p175_p5, %p174_p4 }
   0xe   :  { %p177_p7 = pnand %p176_p6, %p170_p3 }
  0x10   :  { %180 = shalt.err (!%p177_p7)
}
  0x11   :  { %s232_s19 = smov 128   ;;  %s233_s20 = smov 8  }
  0x12   :  { %21 = dma.hbm_to_vmem [thread:$0]  %s294_s0, 256, %s16_s10, [#allocation3], %s232_s19, %s232_s19, %s233_s20  }
  0x13   :  { %s234_s23 = smov [#allocation5]   ;;  %s181_s27 = scalar_lea.hbm %s295_s1, 256 }
  0x14   :  { %s27_s24 = sshll.u32 %s234_s23, 4  ;;  %p182_p8 = scmp.ne.s32.totalorder %s295_s1, %s181_s27  ;;  %s28_s24 = int_to_ptr.vmem [resolvable:$true] %s27_s24 }
  0x15   :  { %p185_p9 = scmp.lt.u32.totalorder %s181_s27, %s295_s1 }
  0x17   :  { %p187_p10 = pnand %p185_p9, %p182_p8 }
  0x19   :  { %190 = shalt.err (!%p187_p10)
}
  0x1a   :  { %s191_s4 = scalar_lea.vmem %s28_s24, 256  ;;  %p196_p12 = scmp.lt.s32.totalorder %s28_s24, %s28_s24 }
  0x1b   :  { %p192_p11 = scmp.ne.s32.totalorder %s28_s24, %s191_s4  ;;  %p197_p13 = scmp.lt.s32.totalorder %s191_s4, %s191_s4 }
  0x1d   :  { %p198_p0 = por %p197_p13, %p196_p12 }
  0x1f   :  { %p199_p1 = pnand %p198_p0, %p192_p11 }
  0x21   :  { %202 = shalt.err (!%p199_p1)
}
  0x22   :  { %33 = dma.hbm_to_vmem [thread:$0]  %s295_s1, 256, %s28_s24, [#allocation6], %s232_s19, %s232_s19, %s233_s20  }
  0x23   :  { %225 = dma.done.wait [#allocation3], 256  }
  0x24   :  { %226 = vsyncadd [#allocation3], 4294967040 }
  0x25   :  { %227 = dma.done.wait [#allocation6], 256  }
  0x26   :  { %228 = vsyncadd [#allocation6], 4294967040  ;;  %v235_v0 = vmov 0   ;;  %vm44_vm0 = vcmask 64512   ;;  %v40_v1 = vld [vmem:[#allocation2] sm:$0xff]  ;;  %v41_v2 = vld [vmem:[#allocation2 + $0x8] sm:$0xff]  ;;  %v67_v12 = vlaneseq }
  0x27   :  { %145 = vset.pattern.permute.xlu1 %v235_v0  ;;  %146 = vset.pattern.permute.xlu0 %v235_v0  ;;  %v42_v3 = vld [vmem:[#allocation5] sm:$0xff]  ;;  %v45_v4 = vsel %vm44_vm0, %v40_v1, -inf  ;;  %v43_v5 = vld [vmem:[#allocation5 + $0x8] sm:$0xff]  ;;  %v48_v6 = vsel %vm44_vm0, %v41_v2, -inf  ;;  %s236_s1 = smov [#allocation7]  }
  0x28   :  { %70 = vperm.xlu1 %145, %v42_v3   ;;  %46 = vmax.xlane.f32.xlu0 %v45_v4  ;;  %v68_v15 = vand.u32 127, %v67_v12  ;;  %s129_s6 = sshll.u32 %s236_s1, 4  ;;  %s130_s6 = int_to_ptr.vmem [resolvable:$true] %s129_s6 }
  0x29   :  { %s203_s7 = scalar_lea.vmem %s130_s6, 16  ;;  %s207_s8 = scalar_lea.vmem %s130_s6, 32 }
  0x2a   :  { %p204_p2 = scmp.ne.s32.totalorder %s130_s6, %s203_s7  ;;  %p208_p3 = scmp.lt.s32.totalorder %s130_s6, %s130_s6 }
  0x2b   :  { %p209_p4 = scmp.lt.s32.totalorder %s207_s8, %s203_s7 }
  0x2c   :  { %73 = vperm.xlu1 %145, %v43_v5   ;;  %49 = vmax.xlane.f32.xlu0 %v48_v6 }
  0x2d   :  { %p210_p5 = por %p209_p4, %p208_p3 }
  0x2f   :  { %p211_p6 = pnand %p210_p5, %p204_p2 }
  0xa7   :  { %v71_v14 = vpop.permute.xlu1 %70 }
  0xa8   :  { %vm75_vm1 = vcmp.eq.s32.totalorder %v68_v15, %v71_v14 }
  0xab   :  { %v74_v17 = vpop.permute.xlu1 %73 }
  0xac   :  { %vm76_vm2 = vcmp.eq.s32.totalorder %v68_v15, %v74_v17 }
  0xb5   :  { %v47_v7 = vpop.xlane.xlu0 %46 }
  0xb6   :  { %v51_v8 = vsub.f32 %v40_v1, %v47_v7 }
  0xb8   :  { %v53_v9 = vmul.f32 1.442695, %v51_v8  ;;  %v77_v19 = vsel %vm75_vm1, %v51_v8, 0.0 }
  0xb9   :  { %v50_v10 = vpop.xlane.xlu0 %49  ;;  %v79_v21 = vsel %vm44_vm0, %v77_v19, 0.0 }
  0xba   :  { %147 = vpow2.f32 %v53_v9  ;;  %v52_v11 = vsub.f32 %v41_v2, %v50_v10 }
  0xbc   :  { %v55_v13 = vmul.f32 1.442695, %v52_v11  ;;  %v78_v23 = vsel %vm76_vm2, %v52_v11, 0.0 }
  0xbd   :  { %v82_v24 = vsel %vm44_vm0, %v78_v23, 0.0 }
  0xbe   :  { %149 = vpow2.f32 %v55_v13 }
  0xc4   :  { %v148_v16 = vpop.eup %147 }
  0xc5   :  { %v57_v18 = vsel %vm44_vm0, %v148_v16, 0.0 }
  0xc6   :  { %58 = vadd.xlane.f32.xlu0 %v57_v18 }
  0xc8   :  { %v150_v20 = vpop.eup %149 }
  0xc9   :  { %v60_v22 = vsel %vm44_vm0, %v150_v20, 0.0 }
  0xca   :  { %80 = vadd.xlane.f32.xlu0 %v79_v21  ;;  %61 = vadd.xlane.f32.xlu1 %v60_v22 }
  0xce   :  { %83 = vadd.xlane.f32.xlu0 %v82_v24 }
 0x153   :  { %v59_v25 = vpop.xlane.xlu0 %58 }
 0x154   :  { %151 = vlog2.f32 %v59_v25 }
 0x157   :  { %v62_v26 = vpop.xlane.xlu1 %61  ;;  %v81_v28 = vpop.xlane.xlu0 %80 }
 0x158   :  { %153 = vlog2.f32 %v62_v26 }
 0x15b   :  { %v84_v34 = vpop.xlane.xlu0 %83 }
 0x15e   :  { %v152_v27 = vpop.eup %151 }
 0x15f   :  { %v64_v29 = vmul.f32 0.6931472, %v152_v27 }
 0x161   :  { %v85_v30 = vsub.f32 %v64_v29, %v81_v28 }
 0x162   :  { %v154_v31 = vpop.eup %153 }
 0x163   :  { %v87_v32 = vmax.f32 %v85_v30, 0.0  ;;  %v66_v33 = vmul.f32 0.6931472, %v154_v31 }
 0x165   :  { %v89_v35 = vsub.f32 0.0, %v87_v32  ;;  %v86_v36 = vsub.f32 %v66_v33, %v84_v34 }
 0x167   :  { %v91_v37 = vmul.f32 1.442695, %v89_v35  ;;  %v88_v38 = vmax.f32 %v86_v36, 0.0 }
 0x169   :  { %155 = vpow2.f32 %v91_v37  ;;  %v90_v39 = vsub.f32 0.0, %v88_v38 }
 0x16b   :  { %v93_v40 = vmul.f32 1.442695, %v90_v39 }
 0x16d   :  { %157 = vpow2.f32 %v93_v40 }
 0x173   :  { %v156_v41 = vpop.eup %155 }
 0x174   :  { %v95_v42 = vsub.f32 1.0, %v156_v41 }
 0x176   :  { %v97_v43 = vmax.f32 %v95_v42, 0.0 }
 0x177   :  { %v158_v44 = vpop.eup %157 }
 0x178   :  { %v96_v45 = vsub.f32 1.0, %v158_v44  ;;  %v99_v46 = vmul.f32 %v97_v43, %v97_v43 }
 0x17a   :  { %v98_v47 = vmax.f32 %v96_v45, 0.0  ;;  %v110_v49 = vmul.f32 %v99_v46, %v87_v32 }
 0x17c   :  { %v100_v48 = vmul.f32 %v98_v47, %v98_v47 }
 0x17e   :  { %v111_v50 = vmul.f32 %v100_v48, %v88_v38 }
 0x180   :  { %v114_v51 = vadd.f32 %v111_v50, %v110_v49 }
 0x182   :  { %v115_v52 = vrot.slane %v114_v51, 4 }
 0x184   :  { %v116_v53 = vadd.f32 %v115_v52, %v114_v51 }
 0x186   :  { %v117_v54 = vrot.slane %v116_v53, 2 }
 0x188   :  { %v118_v55 = vadd.f32 %v117_v54, %v116_v53 }
 0x18a   :  { %v119_v56 = vrot.slane %v118_v55, 1 }
 0x18c   :  { %v120_v57 = vadd.f32 %v119_v56, %v118_v55 }
 0x18e   :  { %122 = vst [vmem:[#allocation7] sm:$0x1] %v120_v57 }
 0x18f   :  { %214 = shalt.err (!%p211_p6)
}
 0x190   :  { %s215_s11 = scalar_lea.hbm %s296_s2, 16 }
 0x191   :  { %p216_p7 = scmp.ne.s32.totalorder %s296_s2, %s215_s11  ;;  %p219_p8 = scmp.lt.u32.totalorder %s215_s11, %s296_s2 }
 0x193   :  { %p221_p9 = pnand %p219_p8, %p216_p7 }
 0x195   :  { %224 = shalt.err (!%p221_p9)
}
 0x196   :  { %132 = dma.vmem_to_hbm [thread:$0]  %s130_s6, 16, %s296_s2, [#allocation4]  }
 0x197   :  { %229 = dma.done.wait [#allocation4], 16  }
 0x198   :  { %230 = vsyncadd [#allocation4], 4294967280 }
 0x199   :  { %136 = vsyncpa [#allocation3], 1 }
 0x19a   :  { %137 = vsyncpa [#allocation6], 1 }
 0x19b   :  { %138 = vsyncpa [#allocation4], 1 }

</bundles_post_ra>
